<compile_context>
chip_gen: v5e
topology: v5e:2x2
jax: 0.10.0
libtpu: 0.0.40
codegen_flags: <defaults>
</compile_context>

<pallas_src>
import jax
import jax.numpy as jnp
from jax.experimental import pallas as pl
from jax.experimental.pallas import tpu as pltpu

LANE = 1024          # lane-dense last dim (multiple of 128 -> unmasked stores)
MAX_TILE_R = 256     # 256 x 1024 f32 block = 1 MiB per buffer


def update_l_kernel(lam5_ref, q_ref, rho_ref, out_ref):
    """out = (Q * lambda5 - rho3) * (1 / lambda5), computed in f32."""
    lam5 = lam5_ref[0]                       # scalar from SMEM
    inv = 1.0 / lam5                         # ONE exact scalar divide (not per element)
    q = q_ref[...].astype(jnp.float32)       # in-kernel promotion (free VPU work)
    rho = rho_ref[...].astype(jnp.float32)
    out_ref[...] = ((q * lam5 - rho) * inv).astype(out_ref.dtype)


def _round_up(x, m):
    return ((x + m - 1) // m) * m


def update_L(Q, lambda5, rho3):
    """Pallas implementation of update_L.forward(Q, lambda5, rho3)."""
    assert Q.shape == rho3.shape
    orig_shape = Q.shape
    orig_dtype = Q.dtype

    total = 1
    for d in orig_shape:
        total *= d

    # Sublane multiple depends on element width (f32: 8, bf16/f16: 16, int8/fp8: 32).
    itemsize = jnp.dtype(orig_dtype).itemsize
    sub = {4: 8, 2: 16, 1: 32}.get(itemsize, 8)

    # Lane-dense padded 2-D view: rows x LANE, rows padded to a whole number of tiles.
    rows = -(-total // LANE)                         # cdiv
    tile_r = min(MAX_TILE_R, _round_up(rows, sub))   # small inputs -> single small block
    padded_rows = _round_up(rows, tile_r)
    padded_total = padded_rows * LANE
    grid_r = padded_rows // tile_r

    pad = padded_total - total
    qf = jnp.pad(Q.reshape(-1), (0, pad)).reshape(padded_rows, LANE)
    rf = jnp.pad(rho3.reshape(-1), (0, pad)).reshape(padded_rows, LANE)
    lam = jnp.asarray(lambda5, jnp.float32).reshape(1)   # scalar -> SMEM (prefetched)

    grid_spec = pltpu.PrefetchScalarGridSpec(
        num_scalar_prefetch=1,
        grid=(grid_r,),
        in_specs=[
            pl.BlockSpec((tile_r, LANE), lambda i, lam: (i, 0)),   # Q
            pl.BlockSpec((tile_r, LANE), lambda i, lam: (i, 0)),   # rho3
        ],
        out_specs=pl.BlockSpec((tile_r, LANE), lambda i, lam: (i, 0)),
    )

    out = pl.pallas_call(
        update_l_kernel,
        out_shape=jax.ShapeDtypeStruct((padded_rows, LANE), orig_dtype),
        grid_spec=grid_spec,
        compiler_params=pltpu.CompilerParams(
            dimension_semantics=("parallel",)),          # shard rows across TCs on v7x
    )(lam, qf, rf)

    return out.reshape(-1)[:total].reshape(orig_shape)


if __name__ == "__main__":
    key = jax.random.PRNGKey(0)
    kQ, kR = jax.random.split(key, 2)

    # Shapes consistent with the module's use (Q is an image-like NCHW tensor).
    N, C, H, W = 2, 3, 16, 16
    Q = jax.random.normal(kQ, (N, C, H, W), jnp.float32)
    rho3 = jax.random.normal(kR, (N, C, H, W), jnp.float32)
    lambda5 = jnp.float32(0.8)

    # --- run Pallas kernel ---
    L_ = jax.block_until_ready(update_L(Q, lambda5, rho3))
    assert L_.shape == (N, C, H, W)
    assert L_.dtype == Q.dtype

    # --- reference (plain-JAX version of the PyTorch forward) ---
    ref = (Q * lambda5 - rho3) / lambda5
    assert jnp.allclose(L_, ref, atol=1e-5, rtol=1e-5)

    # Odd, non-128-multiple shape path (padded + sliced back).
    Q2 = jax.random.normal(kQ, (1, 3, 7, 5), jnp.float32)
    R2 = jax.random.normal(kR, (1, 3, 7, 5), jnp.float32)
    out2 = jax.block_until_ready(update_L(Q2, lambda5, R2))
    ref2 = (Q2 * lambda5 - R2) / lambda5
    assert jnp.allclose(out2, ref2, atol=1e-5, rtol=1e-5)

    # Native low-precision path (no wrapper casts; output stays bf16).
    Qb = jax.random.normal(kQ, (2, 4, 16, 16), jnp.float32).astype(jnp.bfloat16)
    Rb = jax.random.normal(kR, (2, 4, 16, 16), jnp.float32).astype(jnp.bfloat16)
    outb = jax.block_until_ready(update_L(Qb, lambda5, Rb))
    assert outb.dtype == jnp.bfloat16
    refb = ((Qb.astype(jnp.float32) * lambda5 - Rb.astype(jnp.float32)) / lambda5)
    assert jnp.allclose(outb.astype(jnp.float32), refb, atol=2e-2, rtol=2e-2)

    # Larger shape exercising the multi-step row-tiled grid.
    Q3 = jax.random.normal(kQ, (1, 8, 128, 512), jnp.float32)
    R3 = jax.random.normal(kR, (1, 8, 128, 512), jnp.float32)
    out3 = jax.block_until_ready(update_L(Q3, lambda5, R3))
    ref3 = (Q3 * lambda5 - R3) / lambda5
    assert jnp.allclose(out3, ref3, atol=1e-5, rtol=1e-5)

    print("KERNEL_OK")
</pallas_src>

<mosaic_0001>
module attributes {stable_mosaic.version = 11 : i64} {
  func.func @update_l_kernel(%arg0: i32, %arg1: memref<1xf32, #tpu.memory_space<smem>>, %arg2: memref<8x1024xf32, #tpu.memory_space<vmem>>, %arg3: memref<8x1024xf32, #tpu.memory_space<vmem>>, %arg4: memref<8x1024xf32, #tpu.memory_space<vmem>>) attributes {dimension_semantics = [#tpu.dimension_semantics<parallel>], iteration_bounds = array<i64: 1>, scalar_prefetch = 1 : i64, scratch_operands = 0 : i64, tpu.core_type = #tpu.core_type<tc>, window_params = [{transform_indices = @transform_0, window_bounds = array<i64: 8, 1024>}, {transform_indices = @transform_1, window_bounds = array<i64: 8, 1024>}, {transform_indices = @transform_2, window_bounds = array<i64: 8, 1024>}]} {
    %c0 = arith.constant 0 : index
    %0 = memref.load %arg1[%c0] : memref<1xf32, #tpu.memory_space<smem>>
    %cst = arith.constant 1.000000e+00 : f32
    %1 = arith.divf %cst, %0 : f32
    %c0_0 = arith.constant 0 : index
    %c0_1 = arith.constant 0 : index
    %2 = vector.load %arg2[%c0_0, %c0_1] : memref<8x1024xf32, #tpu.memory_space<vmem>>, vector<8x1024xf32>
    %c0_2 = arith.constant 0 : index
    %c0_3 = arith.constant 0 : index
    %3 = vector.load %arg3[%c0_2, %c0_3] : memref<8x1024xf32, #tpu.memory_space<vmem>>, vector<8x1024xf32>
    %4 = vector.broadcast %0 : f32 to vector<8x1024xf32>
    %5 = arith.mulf %2, %4 : vector<8x1024xf32>
    %6 = arith.subf %5, %3 : vector<8x1024xf32>
    %7 = vector.broadcast %1 : f32 to vector<8x1024xf32>
    %8 = arith.mulf %6, %7 : vector<8x1024xf32>
    %c0_4 = arith.constant 0 : index
    %c0_5 = arith.constant 0 : index
    %9 = vector.load %arg4[%c0_4, %c0_5] : memref<8x1024xf32, #tpu.memory_space<vmem>>, vector<8x1024xf32>
    tpu.vector_store %arg4[%c0_4, %c0_5], %8 {strides = array<i32>} : memref<8x1024xf32, #tpu.memory_space<vmem>>, vector<8x1024xf32>,
    return
  }
  func.func @transform_0(%arg0: i32, %arg1: memref<1xf32, #tpu.memory_space<smem>>) -> (i32, i32) {
    %c0_i32 = arith.constant 0 : i32
    %c0_i32_0 = arith.constant 0 : i32
    return %arg0, %c0_i32 : i32, i32
  }
  func.func @transform_1(%arg0: i32, %arg1: memref<1xf32, #tpu.memory_space<smem>>) -> (i32, i32) {
    %c0_i32 = arith.constant 0 : i32
    %c0_i32_0 = arith.constant 0 : i32
    return %arg0, %c0_i32 : i32, i32
  }
  func.func @transform_2(%arg0: i32, %arg1: memref<1xf32, #tpu.memory_space<smem>>) -> (i32, i32) {
    %c0_i32 = arith.constant 0 : i32
    %c0_i32_0 = arith.constant 0 : i32
    return %arg0, %c0_i32 : i32, i32
  }
}

</mosaic_0001>

<bundles_post_ra>
// kernel: tpu_custom_call.1
= control target key start
LH: loop header
LB: loop body
LE: loop exit
PB: predicated region body
PF: predicated region fallthrough
CT: control target
= control target key end

     0   :  { %9 = vsyncpa [#allocation5], 0  ;;  %s247_s0 = inlined_call_operand.<no memory space> [shape: f32[1], index: 0, kind: input, shape index: {}]   ;;  %s248_s1 = inlined_call_operand.hbm [shape: f32[8,1024], index: 1, kind: input, shape index: {}]   ;;  %s249_s2 = inlined_call_operand.hbm [shape: f32[8,1024], index: 2, kind: input, shape index: {}]   ;;  %s250_s3 = inlined_call_operand.hbm [shape: f32[8,1024], index: 3, kind: output, shape index: {}]  }
   0x1   :  { %10 = vsyncpa [#allocation8], 0 }
   0x2   :  { %11 = vsyncpa [#allocation6], 0  ;;  %s17_s14 = sshll.u32 %s248_s1, 4  ;;  %s212_s15 = smov [#allocation4]   ;;  %s18_s14 = int_to_ptr.hbm [resolvable:$true] %s17_s14 }
   0x3   :  { %s19_s16 = sshll.u32 %s212_s15, 4  ;;  %s28_s19 = sshll.u32 %s249_s2, 4  ;;  %s20_s16 = int_to_ptr.vmem [resolvable:$true] %s19_s16  ;;  %s29_s19 = int_to_ptr.hbm [resolvable:$true] %s28_s19 }
   0x4   :  { %22 = dma.hbm_to_vmem [thread:$0]  %s18_s14, 1024, %s20_s16, [#allocation5]  }
   0x5   :  { %s213_s20 = smov [#allocation7]  }
   0x6   :  { %s30_s21 = sshll.u32 %s213_s20, 4  ;;  %s31_s21 = int_to_ptr.vmem [resolvable:$true] %s30_s21 }
   0x7   :  { %33 = dma.hbm_to_vmem [thread:$0]  %s29_s19, 1024, %s31_s21, [#allocation8]  }
   0x8   :  { %206 = dma.done.wait [#allocation5], 1024  }
   0x9   :  { %207 = vsyncadd [#allocation5], 4294966272  ;;  %v43_v0 = vstv %s247_s0 }
   0xa   :  { %208 = dma.done.wait [#allocation8], 1024  }
   0xb   :  { %209 = vsyncadd [#allocation8], 4294966272  ;;  %132 = vrcp.f32 %v43_v0  ;;  %v55_v3 = vand.u32 2147483648, %v43_v0  ;;  %vm49_vm0 = vweird.f32 %v43_v0  ;;  %v53_v5 = vand.u32 2147483647, %v43_v0  ;;  %v59_v11 = vld [vmem:[#allocation4] sm:$0xff] }
   0xc   :  { %v60_v12 = vld [vmem:[#allocation4 + $0x8] sm:$0xff]  ;;  %v61_v13 = vld [vmem:[#allocation4 + $0x10] sm:$0xff]  ;;  %v62_v14 = vld [vmem:[#allocation4 + $0x18] sm:$0xff]  ;;  %v76_v18 = vmul.f32 %v59_v11, %v43_v0  ;;  %s214_s1 = smov [#allocation9]   ;;  %s116_s26 = sshll.u32 %s250_s3, 4  ;;  %s117_s26 = int_to_ptr.hbm [resolvable:$true] %s116_s26 }
   0xd   :  { %v56_v7 = vor.u32 1.1754944e-38, %v55_v3  ;;  %vm54_vm3 = vcmp.eq.f32.partialorder %v53_v5, 8.507059e+37  ;;  %v63_v15 = vld [vmem:[#allocation4 + $0x20] sm:$0xff]  ;;  %v64_v16 = vld [vmem:[#allocation4 + $0x28] sm:$0xff]  ;;  %v65_v17 = vld [vmem:[#allocation4 + $0x30] sm:$0xff]  ;;  %v77_v19 = vmul.f32 %v60_v12, %v43_v0  ;;  %v78_v20 = vmul.f32 %v61_v13, %v43_v0  ;;  %s114_s2 = sshll.u32 %s214_s1, 4  ;;  %s115_s2 = int_to_ptr.vmem [resolvable:$true] %s114_s2 }
   0xe   :  { %v67_v21 = vld [vmem:[#allocation7] sm:$0xff]  ;;  %v68_v22 = vld [vmem:[#allocation7 + $0x8] sm:$0xff]  ;;  %v69_v23 = vld [vmem:[#allocation7 + $0x10] sm:$0xff]  ;;  %v79_v24 = vmul.f32 %v62_v14, %v43_v0  ;;  %v80_v27 = vmul.f32 %v63_v15, %v43_v0  ;;  %v81_v29 = vmul.f32 %v64_v16, %v43_v0  ;;  %v82_v31 = vmul.f32 %v65_v17, %v43_v0 }
   0xf   :  { %v66_v25 = vld [vmem:[#allocation4 + $0x38] sm:$0xff]  ;;  %v71_v28 = vld [vmem:[#allocation7 + $0x20] sm:$0xff]  ;;  %v72_v30 = vld [vmem:[#allocation7 + $0x28] sm:$0xff]  ;;  %v84_v32 = vsub.f32 %v76_v18, %v67_v21  ;;  %v85_v33 = vsub.f32 %v77_v19, %v68_v22  ;;  %v86_v34 = vsub.f32 %v78_v20, %v69_v23 }
  0x10   :  { %v70_v26 = vld [vmem:[#allocation7 + $0x18] sm:$0xff]  ;;  %v73_v35 = vld [vmem:[#allocation7 + $0x30] sm:$0xff]  ;;  %v83_v36 = vmul.f32 %v66_v25, %v43_v0  ;;  %v88_v39 = vsub.f32 %v80_v27, %v71_v28  ;;  %v89_v40 = vsub.f32 %v81_v29, %v72_v30 }
  0x11   :  { %v133_v1 = vpop.eup %132  ;;  %v87_v37 = vsub.f32 %v79_v24, %v70_v26  ;;  %v74_v38 = vld [vmem:[#allocation7 + $0x38] sm:$0xff]  ;;  %v90_v42 = vsub.f32 %v82_v31, %v73_v35 }
  0x12   :  { %v45_v2 = vmul.f32 %v133_v1, %v43_v0  ;;  %vm50_vm1 = vweird.f32 %v133_v1  ;;  %v91_v46 = vsub.f32 %v83_v36, %v74_v38 }
  0x13   :  { %vm51_vm2 = vmor %vm49_vm0, %vm50_vm1 }
  0x14   :  { %v46_v4 = vsub.f32 1.0, %v45_v2 }
  0x16   :  { %v47_v6 = vmul.f32 %v133_v1, %v46_v4 }
  0x18   :  { %v48_v8 = vadd.f32 %v133_v1, %v47_v6 }
  0x1a   :  { %v52_v9 = vsel %vm51_vm2, %v133_v1, %v48_v8 }
  0x1b   :  { %v57_v10 = vsel %vm54_vm3, %v56_v7, %v52_v9 }
  0x1c   :  { %127 = vpush %v57_v10 }
  0x4d   :  { %s128_s0 = spop %127 }
  0x4e   :  { %v92_v41 = vstv %s128_s0 }
  0x4f   :  { %v93_v43 = vmul.f32 %v92_v41, %v84_v32  ;;  %v94_v44 = vmul.f32 %v92_v41, %v85_v33  ;;  %v95_v45 = vmul.f32 %v92_v41, %v86_v34  ;;  %v96_v47 = vmul.f32 %v92_v41, %v87_v37 }
  0x50   :  { %v97_v48 = vmul.f32 %v92_v41, %v88_v39  ;;  %v98_v49 = vmul.f32 %v92_v41, %v89_v40  ;;  %v99_v50 = vmul.f32 %v92_v41, %v90_v42  ;;  %v100_v51 = vmul.f32 %v92_v41, %v91_v46 }
  0x51   :  { %101 = vst [vmem:[#allocation9] sm:$0xff] %v93_v43 }
  0x52   :  { %102 = vst [vmem:[#allocation9 + $0x8] sm:$0xff] %v94_v44 }
  0x53   :  { %103 = vst [vmem:[#allocation9 + $0x10] sm:$0xff] %v95_v45 }
  0x54   :  { %104 = vst [vmem:[#allocation9 + $0x18] sm:$0xff] %v96_v47 }
  0x55   :  { %105 = vst [vmem:[#allocation9 + $0x20] sm:$0xff] %v97_v48 }
  0x56   :  { %106 = vst [vmem:[#allocation9 + $0x28] sm:$0xff] %v98_v49 }
  0x57   :  { %107 = vst [vmem:[#allocation9 + $0x30] sm:$0xff] %v99_v50 }
  0x58   :  { %108 = vst [vmem:[#allocation9 + $0x38] sm:$0xff] %v100_v51 }
  0x59   :  { %119 = dma.vmem_to_hbm [thread:$0]  %s115_s2, 1024, %s117_s26, [#allocation6]  }
  0x5a   :  { %210 = dma.done.wait [#allocation6], 1024  }
  0x5b   :  { %211 = vsyncadd [#allocation6], 4294966272 }
  0x5c   :  { %124 = vsyncpa [#allocation5], 1 }
  0x5d   :  { %125 = vsyncpa [#allocation8], 1 }
  0x5e   :  { %126 = vsyncpa [#allocation6], 1 }

</bundles_post_ra>
